<compile_context>
chip_gen: v7x
topology: tpu7x:2x2x1
jax: 0.10.0
libtpu: 0.0.40
codegen_flags: <defaults>
</compile_context>

<pallas_src>
import jax
import jax.numpy as jnp
from jax.experimental import pallas as pl
from jax.experimental.pallas import tpu as pltpu


def _patch_embed_kernel(x_ref, w_ref, add_ref, o_ref):
    # x_ref  : (TM, K)  row tile of flattened (batch, token) inputs
    #          (token 0 of each batch element is an all-zero row)
    # w_ref  : (K, E)   linear weight, resident across the grid
    # add_ref: (TM, E)  per-row additive term (cls+pos / bias+pos), resident
    # o_ref  : (TM, E)  output tile
    acc = jnp.dot(x_ref[...], w_ref[...], preferred_element_type=jnp.float32)
    o_ref[...] = (acc + add_ref[...]).astype(o_ref.dtype)


def patch_embedding_linear(x, weight, bias, cls_token, positions, patch_size,
                           *, matmul_dtype=None, target_rows_per_tile=512):
    """x: (B, C, H, W) float32.  Returns (B, H*(W//patch_size) + 1, E).

    weight is the nn.Linear weight pre-transposed to (K, E) with K ordered
    (s1 s2 c) = patch-position-major, channel-minor (einops flatten order).
    """
    B, C, H, W = x.shape
    P = patch_size
    Wp = W // P
    N = H * Wp                 # patches per batch element
    K = P * C
    E = weight.shape[1]
    T = N + 1                  # tokens per batch element (cls + patches)

    # einops 'b c (h s1) (w s2) -> b (h w) (s1 s2 c)', s1=1, s2=P (host-side).
    xp = jnp.transpose(x.reshape(B, C, H, Wp, P), (0, 2, 3, 4, 1)).reshape(B, N, K)

    # Whole batch elements per grid step; multiple of 16 keeps row tiles
    # sublane-aligned for f32 and bf16.
    tb = max(1, target_rows_per_tile // T)
    tb = ((tb + 15) // 16) * 16
    Bp = ((B + tb - 1) // tb) * tb          # pad batch to a multiple of tb
    TM = tb * T                              # rows per grid step
    grid = (Bp // tb,)

    # Fold cls token / bias / positions into one per-token add vector:
    #   token 0:   0 @ W + (cls + pos[0])
    #   token t>0: xp[:, t-1] @ W + (bias + pos[t])
    add_vec = jnp.concatenate(
        [cls_token.reshape(1, E) + positions[0:1],
         positions[1:] + bias.reshape(1, E)], axis=0)           # (T, E)
    add_tile = jnp.tile(add_vec, (tb, 1)).astype(jnp.float32)   # (TM, E)

    # Insert the zero cls-input row per batch element and pad batches, then
    # flatten (batch, token) into the matmul M dimension.
    xp_aug = jnp.pad(xp, ((0, Bp - B), (1, 0), (0, 0)))         # (Bp, T, K)
    rows = xp_aug.reshape(Bp * T, K)

    if matmul_dtype is not None:
        rows = rows.astype(matmul_dtype)
        w_in = weight.astype(matmul_dtype)
    else:
        w_in = weight

    out_flat = pl.pallas_call(
        _patch_embed_kernel,
        out_shape=jax.ShapeDtypeStruct((Bp * T, E), x.dtype),
        grid_spec=pltpu.PrefetchScalarGridSpec(
            num_scalar_prefetch=0,
            grid=grid,
            in_specs=[
                pl.BlockSpec((TM, K), lambda i: (i, 0)),   # streamed activations
                pl.BlockSpec((K, E), lambda i: (0, 0)),    # resident weight
                pl.BlockSpec((TM, E), lambda i: (0, 0)),   # resident add tile
            ],
            out_specs=pl.BlockSpec((TM, E), lambda i: (i, 0)),
        ),
        compiler_params=pltpu.CompilerParams(
            dimension_semantics=("parallel",)),
    )(rows, w_in, add_tile)

    return out_flat.reshape(Bp, T, E)[:B]


def _reference(x, weight, bias, cls_token, positions, patch_size):
    B, C, H, W = x.shape
    P = patch_size
    Wp = W // P
    xp = jnp.transpose(x.reshape(B, C, H, Wp, P), (0, 2, 3, 4, 1)).reshape(
        B, H * Wp, P * C)
    proj = xp @ weight + bias[None, None, :]
    cls = jnp.broadcast_to(cls_token.reshape(1, 1, -1), (B, 1, weight.shape[1]))
    out = jnp.concatenate([cls, proj], axis=1)
    return out + positions[None, :, :]


if __name__ == "__main__":
    # Small, module-consistent shapes: B=2, C=4, H=1, W=seq_length=64,
    # patch_size=8, emb_size=32  ->  n_patches=8, tokens=9.
    B, C, H = 2, 4, 1
    patch_size = 8
    seq_length = 64
    emb_size = 32
    n_tokens = seq_length // patch_size + 1
    K = patch_size * C

    key = jax.random.PRNGKey(0)
    kx, kw, kb, kc, kp = jax.random.split(key, 5)
    x = jax.random.normal(kx, (B, C, H, seq_length), dtype=jnp.float32)
    # nn.Linear(K, E): weight (E, K); we store it pre-transposed as (K, E).
    weight = jax.random.normal(kw, (K, emb_size), dtype=jnp.float32) * 0.05
    bias = jax.random.normal(kb, (emb_size,), dtype=jnp.float32) * 0.05
    cls_token = jax.random.normal(kc, (1, 1, emb_size), dtype=jnp.float32)
    positions = jax.random.normal(kp, (n_tokens, emb_size), dtype=jnp.float32)

    ref = _reference(x, weight, bias, cls_token, positions, patch_size)

    # f32 path (matches module numerics).
    out = patch_embedding_linear(x, weight, bias, cls_token, positions, patch_size)
    out = jax.block_until_ready(out)
    assert out.shape == (B, n_tokens, emb_size), out.shape
    assert jnp.allclose(out, ref, atol=1e-5, rtol=1e-5), "f32 mismatch vs reference"

    # bf16 matmul-input path (memory-bound optimization; f32 accumulation).
    out_bf16 = patch_embedding_linear(x, weight, bias, cls_token, positions,
                                      patch_size, matmul_dtype=jnp.bfloat16)
    out_bf16 = jax.block_until_ready(out_bf16)
    assert out_bf16.shape == (B, n_tokens, emb_size), out_bf16.shape
    assert jnp.allclose(out_bf16, ref, atol=5e-2, rtol=5e-2), "bf16 mismatch vs reference"

    print("KERNEL_OK")
</pallas_src>

<mosaic_0001>
module attributes {stable_mosaic.version = 11 : i64} {
  func.func @_patch_embed_kernel(%arg0: i32, %arg1: memref<576x32xf32, #tpu.memory_space<vmem>>, %arg2: memref<32x32xf32, #tpu.memory_space<vmem>>, %arg3: memref<576x32xf32, #tpu.memory_space<vmem>>, %arg4: memref<576x32xf32, #tpu.memory_space<vmem>>) attributes {dimension_semantics = [#tpu.dimension_semantics<parallel>], iteration_bounds = array<i64: 1>, scalar_prefetch = 0 : i64, scratch_operands = 0 : i64, tpu.core_type = #tpu.core_type<tc>, window_params = [{transform_indices = @transform_0, window_bounds = array<i64: 576, 32>}, {pipeline_mode = #tpu.pipeline_mode<synchronous>, transform_indices = @transform_1, window_bounds = array<i64: 32, 32>}, {pipeline_mode = #tpu.pipeline_mode<synchronous>, transform_indices = @transform_2, window_bounds = array<i64: 576, 32>}, {transform_indices = @transform_3, window_bounds = array<i64: 576, 32>}]} {
    %c0 = arith.constant 0 : index
    %c0_0 = arith.constant 0 : index
    %0 = vector.load %arg1[%c0, %c0_0] : memref<576x32xf32, #tpu.memory_space<vmem>>, vector<576x32xf32>
    %c0_1 = arith.constant 0 : index
    %c0_2 = arith.constant 0 : index
    %1 = vector.load %arg2[%c0_1, %c0_2] : memref<32x32xf32, #tpu.memory_space<vmem>>, vector<32x32xf32>
    %cst = arith.constant dense<0.000000e+00> : vector<576x32xf32>
    %2 = tpu.matmul %0, %1, %cst {dimension_numbers = #tpu.dot_dimension_numbers<[1], [0], [0], [1], [0, 0, 1, 1], [], []>} : vector<576x32xf32>, vector<32x32xf32>, vector<576x32xf32> -> vector<576x32xf32>
    %c0_3 = arith.constant 0 : index
    %c0_4 = arith.constant 0 : index
    %3 = vector.load %arg3[%c0_3, %c0_4] : memref<576x32xf32, #tpu.memory_space<vmem>>, vector<576x32xf32>
    %4 = arith.addf %2, %3 : vector<576x32xf32>
    %c0_5 = arith.constant 0 : index
    %c0_6 = arith.constant 0 : index
    %5 = vector.load %arg4[%c0_5, %c0_6] : memref<576x32xf32, #tpu.memory_space<vmem>>, vector<576x32xf32>
    tpu.vector_store %arg4[%c0_5, %c0_6], %4 {strides = array<i32>} : memref<576x32xf32, #tpu.memory_space<vmem>>, vector<576x32xf32>,
    return
  }
  func.func @transform_0(%arg0: i32) -> (i32, i32) {
    %c0_i32 = arith.constant 0 : i32
    %c0_i32_0 = arith.constant 0 : i32
    return %arg0, %c0_i32 : i32, i32
  }
  func.func @transform_1(%arg0: i32) -> (i32, i32) {
    %c0_i32 = arith.constant 0 : i32
    %c0_i32_0 = arith.constant 0 : i32
    %c0_i32_1 = arith.constant 0 : i32
    return %c0_i32, %c0_i32_0 : i32, i32
  }
  func.func @transform_2(%arg0: i32) -> (i32, i32) {
    %c0_i32 = arith.constant 0 : i32
    %c0_i32_0 = arith.constant 0 : i32
    %c0_i32_1 = arith.constant 0 : i32
    return %c0_i32, %c0_i32_0 : i32, i32
  }
  func.func @transform_3(%arg0: i32) -> (i32, i32) {
    %c0_i32 = arith.constant 0 : i32
    %c0_i32_0 = arith.constant 0 : i32
    return %arg0, %c0_i32 : i32, i32
  }
}

</mosaic_0001>

<bundles_post_ra>
// kernel: tpu_custom_call.1
= control target key start
LH: loop header
LB: loop body
LE: loop exit
PB: predicated region body
PF: predicated region fallthrough
CT: control target
= control target key end

     0   :  { %vm162_vm0 = vcmask 261120   ;;  %s1980_s1 = inlined_call_operand.vmem [shape: f32[32,32], index: 1, kind: input, shape index: {}]   ;;  %s1981_s0 = inlined_call_operand.vmem [shape: f32[576,32], index: 0, kind: input, shape index: {}]   ;;  %s1982_s2 = inlined_call_operand.vmem [shape: f32[576,32], index: 2, kind: input, shape index: {}]   ;;  %s1983_s3 = inlined_call_operand.vmem [shape: f32[576,32], index: 3, kind: output, shape index: {}]  }
   0x1   :  { %v86_v0 = vld [vmem:[%s1980_s1] sm:$0xff]  ;;  %v87_v1 = vld [vmem:[%s1980_s1 + $0x8] sm:$0xff]  ;;  %v88_v2 = vld [vmem:[%s1980_s1 + $0x10] sm:$0xff] }
   0x2   :  { %v1144_v3 = vpack.c.bf16 %v87_v1, %v86_v0  ;;  %v89_v4 = vld [vmem:[%s1980_s1 + $0x18] sm:$0xff]  ;;  %v14_v5 = vld [vmem:[%s1981_s0] sm:$0xff]  ;;  %v15_v8 = vld [vmem:[%s1981_s0 + $0x8] sm:$0xff] }
   0x3   :  { %v50_v6 = vld [vmem:[%s1981_s0 + $0x120] sm:$0xff]  ;;  %v1148_v7 = vpack.c.bf16 %v89_v4, %v88_v2  ;;  %1036 = vmatprep.mubr.msk.f32.mxu0 %vm162_vm0, %v14_v5  ;;  %v51_v9 = vld [vmem:[%s1981_s0 + $0x128] sm:$0xff]  ;;  %v16_v10 = vld [vmem:[%s1981_s0 + $0x10] sm:$0xff] }
   0x4   :  { %1090 = vmatprep.mubr.msk.f32.mxu1 %vm162_vm0, %v50_v6  ;;  %1145 = vmatprep.subr.bf16.mxu0 %v1144_v3  ;;  %v52_v11 = vld [vmem:[%s1981_s0 + $0x130] sm:$0xff]  ;;  %v17_v12 = vld [vmem:[%s1981_s0 + $0x18] sm:$0xff]  ;;  %v18_v14 = vld [vmem:[%s1981_s0 + $0x20] sm:$0xff] }
   0x5   :  { %1152 = vmatprep.subr.bf16.mxu1 %v1144_v3  ;;  %1147 = vmatpush3.bf16.msra.mxu0 %v1144_v3  ;;  %v53_v13 = vld [vmem:[%s1981_s0 + $0x138] sm:$0xff]  ;;  %v54_v15 = vld [vmem:[%s1981_s0 + $0x140] sm:$0xff]  ;;  %v19_v16 = vld [vmem:[%s1981_s0 + $0x28] sm:$0xff] }
   0x6   :  { %1154 = vmatpush3.bf16.msra.mxu1 %v1144_v3  ;;  %1149 = vmatprep.subr.bf16.mxu0 %v1148_v7  ;;  %v55_v17 = vld [vmem:[%s1981_s0 + $0x148] sm:$0xff]  ;;  %v20_v18 = vld [vmem:[%s1981_s0 + $0x30] sm:$0xff]  ;;  %v21_v20 = vld [vmem:[%s1981_s0 + $0x38] sm:$0xff] }
   0x7   :  { %1153 = vmatprep.subr.bf16.mxu1 %v1148_v7  ;;  %v56_v19 = vld [vmem:[%s1981_s0 + $0x150] sm:$0xff]  ;;  %v57_v21 = vld [vmem:[%s1981_s0 + $0x158] sm:$0xff]  ;;  %v22_v22 = vld [vmem:[%s1981_s0 + $0x40] sm:$0xff] }
   0x8   :  { %v58_v23 = vld [vmem:[%s1981_s0 + $0x160] sm:$0xff]  ;;  %v23_v24 = vld [vmem:[%s1981_s0 + $0x48] sm:$0xff]  ;;  %v24_v26 = vld [vmem:[%s1981_s0 + $0x50] sm:$0xff] }
   0x9   :  { %1151 = vmatpush3.bf16.msra.mxu0 %v1148_v7  ;;  %v59_v25 = vld [vmem:[%s1981_s0 + $0x168] sm:$0xff]  ;;  %v60_v27 = vld [vmem:[%s1981_s0 + $0x170] sm:$0xff]  ;;  %v25_v28 = vld [vmem:[%s1981_s0 + $0x58] sm:$0xff] }
   0xa   :  { %1155 = vmatpush3.bf16.msra.mxu1 %v1148_v7  ;;  %v61_v29 = vld [vmem:[%s1981_s0 + $0x178] sm:$0xff]  ;;  %v26_v30 = vld [vmem:[%s1981_s0 + $0x60] sm:$0xff]  ;;  %v27_v32 = vld [vmem:[%s1981_s0 + $0x68] sm:$0xff] }
   0xb   :  { %v62_v31 = vld [vmem:[%s1981_s0 + $0x180] sm:$0xff]  ;;  %v63_v33 = vld [vmem:[%s1981_s0 + $0x188] sm:$0xff]  ;;  %v28_v34 = vld [vmem:[%s1981_s0 + $0x70] sm:$0xff] }
   0xc   :  { %1037 = vmatmul.mubr.msk.f32.vlgmr.msra.gmra.mrb[0].mxu0 %vm162_vm0, %v15_v8  ;;  %v64_v35 = vld [vmem:[%s1981_s0 + $0x190] sm:$0xff]  ;;  %v29_v36 = vld [vmem:[%s1981_s0 + $0x78] sm:$0xff]  ;;  %v30_v38 = vld [vmem:[%s1981_s0 + $0x80] sm:$0xff] }
   0xd   :  { %1091 = vmatmul.mubr.msk.f32.vlgmr.msra.gmra.mrb[0].mxu1 %vm162_vm0, %v51_v9  ;;  %1039 = vmatprep.mubr.msk.f32.mxu0 %vm162_vm0, %v16_v10  ;;  %v65_v37 = vld [vmem:[%s1981_s0 + $0x198] sm:$0xff]  ;;  %v66_v39 = vld [vmem:[%s1981_s0 + $0x1a0] sm:$0xff]  ;;  %v31_v40 = vld [vmem:[%s1981_s0 + $0x88] sm:$0xff] }
   0xe   :  { %1093 = vmatprep.mubr.msk.f32.mxu1 %vm162_vm0, %v52_v11  ;;  %v67_v41 = vld [vmem:[%s1981_s0 + $0x1a8] sm:$0xff]  ;;  %v32_v42 = vld [vmem:[%s1981_s0 + $0x90] sm:$0xff]  ;;  %v33_v44 = vld [vmem:[%s1981_s0 + $0x98] sm:$0xff] }
   0xf   :  { %v68_v43 = vld [vmem:[%s1981_s0 + $0x1b0] sm:$0xff]  ;;  %v69_v45 = vld [vmem:[%s1981_s0 + $0x1b8] sm:$0xff]  ;;  %v34_v46 = vld [vmem:[%s1981_s0 + $0xa0] sm:$0xff] }
  0x10   :  { %1040 = vmatmul.mubr.msk.f32.gmra.mrb[2].mxu0 %vm162_vm0, %v17_v12  ;;  %v70_v47 = vld [vmem:[%s1981_s0 + $0x1c0] sm:$0xff]  ;;  %v35_v48 = vld [vmem:[%s1981_s0 + $0xa8] sm:$0xff]  ;;  %v36_v50 = vld [vmem:[%s1981_s0 + $0xb0] sm:$0xff] }
  0x11   :  { %1094 = vmatmul.mubr.msk.f32.gmra.mrb[2].mxu1 %vm162_vm0, %v53_v13  ;;  %1042 = vmatprep.mubr.msk.f32.mxu0 %vm162_vm0, %v18_v14  ;;  %v71_v49 = vld [vmem:[%s1981_s0 + $0x1c8] sm:$0xff]  ;;  %v72_v51 = vld [vmem:[%s1981_s0 + $0x1d0] sm:$0xff]  ;;  %v37_v52 = vld [vmem:[%s1981_s0 + $0xb8] sm:$0xff] }
  0x12   :  { %1096 = vmatprep.mubr.msk.f32.mxu1 %vm162_vm0, %v54_v15  ;;  %v73_v53 = vld [vmem:[%s1981_s0 + $0x1d8] sm:$0xff]  ;;  %v38_v54 = vld [vmem:[%s1981_s0 + $0xc0] sm:$0xff]  ;;  %v39_v56 = vld [vmem:[%s1981_s0 + $0xc8] sm:$0xff] }
  0x13   :  { %v74_v55 = vld [vmem:[%s1981_s0 + $0x1e0] sm:$0xff]  ;;  %v75_v57 = vld [vmem:[%s1981_s0 + $0x1e8] sm:$0xff]  ;;  %v40_v58 = vld [vmem:[%s1981_s0 + $0xd0] sm:$0xff] }
  0x14   :  { %1043 = vmatmul.mubr.msk.f32.gmra.mrb[4].mxu0 %vm162_vm0, %v19_v16  ;;  %v76_v59 = vld [vmem:[%s1981_s0 + $0x1f0] sm:$0xff]  ;;  %v41_v60 = vld [vmem:[%s1981_s0 + $0xd8] sm:$0xff]  ;;  %v42_v62 = vld [vmem:[%s1981_s0 + $0xe0] sm:$0xff] }
  0x15   :  { %1097 = vmatmul.mubr.msk.f32.gmra.mrb[4].mxu1 %vm162_vm0, %v55_v17  ;;  %1045 = vmatprep.mubr.msk.f32.mxu0 %vm162_vm0, %v20_v18  ;;  %v77_v61 = vld [vmem:[%s1981_s0 + $0x1f8] sm:$0xff]  ;;  %v78_v63 = vld [vmem:[%s1981_s0 + $0x200] sm:$0xff]  ;;  %v43_v0 = vld [vmem:[%s1981_s0 + $0xe8] sm:$0xff] }
  0x16   :  { %1099 = vmatprep.mubr.msk.f32.mxu1 %vm162_vm0, %v56_v19  ;;  %v79_v1 = vld [vmem:[%s1981_s0 + $0x208] sm:$0xff]  ;;  %v44_v2 = vld [vmem:[%s1981_s0 + $0xf0] sm:$0xff]  ;;  %v45_v4 = vld [vmem:[%s1981_s0 + $0xf8] sm:$0xff] }
  0x17   :  { %v80_v3 = vld [vmem:[%s1981_s0 + $0x210] sm:$0xff]  ;;  %v81_v5 = vld [vmem:[%s1981_s0 + $0x218] sm:$0xff]  ;;  %v46_v6 = vld [vmem:[%s1981_s0 + $0x100] sm:$0xff] }
  0x18   :  { %1046 = vmatmul.mubr.msk.f32.gmra.mrb[6].mxu0 %vm162_vm0, %v21_v20  ;;  %v82_v7 = vld [vmem:[%s1981_s0 + $0x220] sm:$0xff]  ;;  %v47_v8 = vld [vmem:[%s1981_s0 + $0x108] sm:$0xff]  ;;  %v48_v10 = vld [vmem:[%s1981_s0 + $0x110] sm:$0xff] }
  0x19   :  { %1100 = vmatmul.mubr.msk.f32.gmra.mrb[6].mxu1 %vm162_vm0, %v57_v21  ;;  %1048 = vmatprep.mubr.msk.f32.mxu0 %vm162_vm0, %v22_v22  ;;  %v83_v9 = vld [vmem:[%s1981_s0 + $0x228] sm:$0xff]  ;;  %v84_v11 = vld [vmem:[%s1981_s0 + $0x230] sm:$0xff]  ;;  %v49_v12 = vld [vmem:[%s1981_s0 + $0x118] sm:$0xff] }
  0x1a   :  { %1102 = vmatprep.mubr.msk.f32.mxu1 %vm162_vm0, %v58_v23  ;;  %v85_v13 = vld [vmem:[%s1981_s0 + $0x238] sm:$0xff]  ;;  %v91_v14 = vld [vmem:[%s1982_s2 + $0x8] sm:$0xff]  ;;  %v90_v16 = vld [vmem:[%s1982_s2] sm:$0xff] }
  0x1b   :  { %v127_v15 = vld [vmem:[%s1982_s2 + $0x128] sm:$0xff]  ;;  %v126_v17 = vld [vmem:[%s1982_s2 + $0x120] sm:$0xff] }
  0x1c   :  { %1049 = vmatmul.mubr.msk.f32.gmra.mrb[8].mxu0 %vm162_vm0, %v23_v24 }
  0x1d   :  { %1103 = vmatmul.mubr.msk.f32.gmra.mrb[8].mxu1 %vm162_vm0, %v59_v25  ;;  %1051 = vmatprep.mubr.msk.f32.mxu0 %vm162_vm0, %v24_v26  ;;  %v93_v26 = vld [vmem:[%s1982_s2 + $0x18] sm:$0xff] }
  0x1e   :  { %1105 = vmatprep.mubr.msk.f32.mxu1 %vm162_vm0, %v60_v27  ;;  %v129_v27 = vld [vmem:[%s1982_s2 + $0x138] sm:$0xff] }
  0x20   :  { %1052 = vmatmul.mubr.msk.f32.gmra.mrb[10].mxu0 %vm162_vm0, %v25_v28  ;;  %v92_v28 = vld [vmem:[%s1982_s2 + $0x10] sm:$0xff] }
  0x21   :  { %1106 = vmatmul.mubr.msk.f32.gmra.mrb[10].mxu1 %vm162_vm0, %v61_v29  ;;  %1054 = vmatprep.mubr.msk.f32.mxu0 %vm162_vm0, %v26_v30  ;;  %v128_v29 = vld [vmem:[%s1982_s2 + $0x130] sm:$0xff] }
  0x22   :  { %1108 = vmatprep.mubr.msk.f32.mxu1 %vm162_vm0, %v62_v31 }
  0x24   :  { %1055 = vmatmul.mubr.msk.f32.gmra.mrb[12].mxu0 %vm162_vm0, %v27_v32 }
  0x25   :  { %1109 = vmatmul.mubr.msk.f32.gmra.mrb[12].mxu1 %vm162_vm0, %v63_v33  ;;  %1057 = vmatprep.mubr.msk.f32.mxu0 %vm162_vm0, %v28_v34 }
  0x26   :  { %1111 = vmatprep.mubr.msk.f32.mxu1 %vm162_vm0, %v64_v35 }
  0x28   :  { %1058 = vmatmul.mubr.msk.f32.gmra.mrb[14].mxu0 %vm162_vm0, %v29_v36 }
  0x29   :  { %1112 = vmatmul.mubr.msk.f32.gmra.mrb[14].mxu1 %vm162_vm0, %v65_v37  ;;  %1060 = vmatprep.mubr.msk.f32.mxu0 %vm162_vm0, %v30_v38  ;;  %v95_v38 = vld [vmem:[%s1982_s2 + $0x28] sm:$0xff] }
  0x2a   :  { %1114 = vmatprep.mubr.msk.f32.mxu1 %vm162_vm0, %v66_v39  ;;  %v131_v39 = vld [vmem:[%s1982_s2 + $0x148] sm:$0xff] }
  0x2c   :  { %1061 = vmatmul.mubr.msk.f32.gmra.mrb[16].mxu0 %vm162_vm0, %v31_v40  ;;  %v94_v40 = vld [vmem:[%s1982_s2 + $0x20] sm:$0xff] }
  0x2d   :  { %1115 = vmatmul.mubr.msk.f32.gmra.mrb[16].mxu1 %vm162_vm0, %v67_v41  ;;  %1063 = vmatprep.mubr.msk.f32.mxu0 %vm162_vm0, %v32_v42  ;;  %v130_v41 = vld [vmem:[%s1982_s2 + $0x140] sm:$0xff] }
  0x2e   :  { %1117 = vmatprep.mubr.msk.f32.mxu1 %vm162_vm0, %v68_v43 }
  0x30   :  { %1064 = vmatmul.mubr.msk.f32.gmra.mrb[18].mxu0 %vm162_vm0, %v33_v44 }
  0x31   :  { %1118 = vmatmul.mubr.msk.f32.gmra.mrb[18].mxu1 %vm162_vm0, %v69_v45  ;;  %1066 = vmatprep.mubr.msk.f32.mxu0 %vm162_vm0, %v34_v46 }
  0x32   :  { %1120 = vmatprep.mubr.msk.f32.mxu1 %vm162_vm0, %v70_v47 }
  0x34   :  { %1067 = vmatmul.mubr.msk.f32.gmra.mrb[20].mxu0 %vm162_vm0, %v35_v48 }
  0x35   :  { %1121 = vmatmul.mubr.msk.f32.gmra.mrb[20].mxu1 %vm162_vm0, %v71_v49  ;;  %1069 = vmatprep.mubr.msk.f32.mxu0 %vm162_vm0, %v36_v50  ;;  %v97_v50 = vld [vmem:[%s1982_s2 + $0x38] sm:$0xff] }
  0x36   :  { %1123 = vmatprep.mubr.msk.f32.mxu1 %vm162_vm0, %v72_v51  ;;  %v133_v51 = vld [vmem:[%s1982_s2 + $0x158] sm:$0xff] }
  0x38   :  { %1070 = vmatmul.mubr.msk.f32.gmra.mrb[22].mxu0 %vm162_vm0, %v37_v52  ;;  %v96_v52 = vld [vmem:[%s1982_s2 + $0x30] sm:$0xff] }
  0x39   :  { %1124 = vmatmul.mubr.msk.f32.gmra.mrb[22].mxu1 %vm162_vm0, %v73_v53  ;;  %1072 = vmatprep.mubr.msk.f32.mxu0 %vm162_vm0, %v38_v54  ;;  %v132_v53 = vld [vmem:[%s1982_s2 + $0x150] sm:$0xff] }
  0x3a   :  { %1126 = vmatprep.mubr.msk.f32.mxu1 %vm162_vm0, %v74_v55 }
  0x3c   :  { %1073 = vmatmul.mubr.msk.f32.gmra.mrb[24].mxu0 %vm162_vm0, %v39_v56 }
  0x3d   :  { %1127 = vmatmul.mubr.msk.f32.gmra.mrb[24].mxu1 %vm162_vm0, %v75_v57  ;;  %1075 = vmatprep.mubr.msk.f32.mxu0 %vm162_vm0, %v40_v58 }
  0x3e   :  { %1129 = vmatprep.mubr.msk.f32.mxu1 %vm162_vm0, %v76_v59 }
  0x40   :  { %1076 = vmatmul.mubr.msk.f32.gmra.mrb[26].mxu0 %vm162_vm0, %v41_v60 }
  0x41   :  { %1130 = vmatmul.mubr.msk.f32.gmra.mrb[26].mxu1 %vm162_vm0, %v77_v61  ;;  %1078 = vmatprep.mubr.msk.f32.mxu0 %vm162_vm0, %v42_v62  ;;  %v99_v62 = vld [vmem:[%s1982_s2 + $0x48] sm:$0xff] }
  0x42   :  { %1132 = vmatprep.mubr.msk.f32.mxu1 %vm162_vm0, %v78_v63  ;;  %v135_v63 = vld [vmem:[%s1982_s2 + $0x168] sm:$0xff] }
  0x44   :  { %1079 = vmatmul.mubr.msk.f32.gmra.mrb[28].mxu0 %vm162_vm0, %v43_v0  ;;  %v98_v0 = vld [vmem:[%s1982_s2 + $0x40] sm:$0xff] }
  0x45   :  { %1133 = vmatmul.mubr.msk.f32.gmra.mrb[28].mxu1 %vm162_vm0, %v79_v1  ;;  %1081 = vmatprep.mubr.msk.f32.mxu0 %vm162_vm0, %v44_v2  ;;  %v134_v1 = vld [vmem:[%s1982_s2 + $0x160] sm:$0xff] }
  0x46   :  { %1135 = vmatprep.mubr.msk.f32.mxu1 %vm162_vm0, %v80_v3 }
  0x48   :  { %1082 = vmatmul.mubr.msk.f32.gmra.mrb[30].mxu0 %vm162_vm0, %v45_v4 }
  0x49   :  { %1136 = vmatmul.mubr.msk.f32.gmra.mrb[30].mxu1 %vm162_vm0, %v81_v5  ;;  %1084 = vmatprep.mubr.msk.f32.mxu0 %vm162_vm0, %v46_v6 }
  0x4a   :  { %1138 = vmatprep.mubr.msk.f32.mxu1 %vm162_vm0, %v82_v7 }
  0x4c   :  { %1085 = vmatmul.mubr.msk.f32.gmra.mrb[32].mxu0 %vm162_vm0, %v47_v8 }
  0x4d   :  { %1139 = vmatmul.mubr.msk.f32.gmra.mrb[32].mxu1 %vm162_vm0, %v83_v9  ;;  %1087 = vmatprep.mubr.msk.f32.mxu0 %vm162_vm0, %v48_v10  ;;  %v101_v10 = vld [vmem:[%s1982_s2 + $0x58] sm:$0xff] }
  0x4e   :  { %1141 = vmatprep.mubr.msk.f32.mxu1 %vm162_vm0, %v84_v11  ;;  %v137_v11 = vld [vmem:[%s1982_s2 + $0x178] sm:$0xff] }
  0x50   :  { %1088 = vmatmul.mubr.msk.f32.gmra.mrb[34].mxu0 %vm162_vm0, %v49_v12  ;;  %v100_v12 = vld [vmem:[%s1982_s2 + $0x50] sm:$0xff] }
  0x51   :  { %1142 = vmatmul.mubr.msk.f32.gmra.mrb[34].mxu1 %vm162_vm0, %v85_v13  ;;  %v136_v13 = vld [vmem:[%s1982_s2 + $0x170] sm:$0xff] }
  0xdf   :  { %v1038_v18 = vpop.f32.mrb[0].mxu0 }
  0xe0   :  { %v1092_v19 = vpop.f32.mrb[0].mxu1  ;;  %v451_v20 = vadd.f32 %v1038_v18, %v91_v14  ;;  %v445_v22 = vpop.f32.mrb[1].mxu0 }
  0xe1   :  { %v631_v21 = vadd.f32 %v1092_v19, %v127_v15  ;;  %v625_v23 = vpop.f32.mrb[1].mxu1  ;;  %v446_v24 = vadd.f32 %v445_v22, %v90_v16  ;;  %v103_v22 = vld [vmem:[%s1982_s2 + $0x68] sm:$0xff] }
  0xe2   :  { %v626_v25 = vadd.f32 %v625_v23, %v126_v17  ;;  %805 = vst.msk [vmem:[%s1983_s3 + $0x8] sm:$0xff] %vm162_vm0, %v451_v20  ;;  %v139_v23 = vld [vmem:[%s1982_s2 + $0x188] sm:$0xff] }
  0xe3   :  { %841 = vst.msk [vmem:[%s1983_s3 + $0x128] sm:$0xff] %vm162_vm0, %v631_v21  ;;  %804 = vst.msk [vmem:[%s1983_s3] sm:$0xff] %vm162_vm0, %v446_v24  ;;  %v1041_v30 = vpop.f32.mrb[2].mxu0  ;;  %v102_v24 = vld [vmem:[%s1982_s2 + $0x60] sm:$0xff] }
  0xe4   :  { %840 = vst.msk [vmem:[%s1983_s3 + $0x120] sm:$0xff] %vm162_vm0, %v626_v25  ;;  %v1095_v31 = vpop.f32.mrb[2].mxu1  ;;  %v461_v32 = vadd.f32 %v1041_v30, %v93_v26  ;;  %v455_v34 = vpop.f32.mrb[3].mxu0  ;;  %v138_v25 = vld [vmem:[%s1982_s2 + $0x180] sm:$0xff] }
  0xe5   :  { %v641_v33 = vadd.f32 %v1095_v31, %v129_v27  ;;  %v635_v35 = vpop.f32.mrb[3].mxu1  ;;  %v456_v36 = vadd.f32 %v455_v34, %v92_v28  ;;  %v105_v34 = vld [vmem:[%s1982_s2 + $0x78] sm:$0xff] }
  0xe6   :  { %v636_v37 = vadd.f32 %v635_v35, %v128_v29  ;;  %807 = vst.msk [vmem:[%s1983_s3 + $0x18] sm:$0xff] %vm162_vm0, %v461_v32  ;;  %v141_v35 = vld [vmem:[%s1982_s2 + $0x198] sm:$0xff] }
  0xe7   :  { %843 = vst.msk [vmem:[%s1983_s3 + $0x138] sm:$0xff] %vm162_vm0, %v641_v33  ;;  %806 = vst.msk [vmem:[%s1983_s3 + $0x10] sm:$0xff] %vm162_vm0, %v456_v36  ;;  %v1044_v42 = vpop.f32.mrb[4].mxu0  ;;  %v104_v36 = vld [vmem:[%s1982_s2 + $0x70] sm:$0xff] }
  0xe8   :  { %842 = vst.msk [vmem:[%s1983_s3 + $0x130] sm:$0xff] %vm162_vm0, %v636_v37  ;;  %v1098_v43 = vpop.f32.mrb[4].mxu1  ;;  %v471_v44 = vadd.f32 %v1044_v42, %v95_v38  ;;  %v465_v46 = vpop.f32.mrb[5].mxu0  ;;  %v140_v37 = vld [vmem:[%s1982_s2 + $0x190] sm:$0xff] }
  0xe9   :  { %v651_v45 = vadd.f32 %v1098_v43, %v131_v39  ;;  %v645_v47 = vpop.f32.mrb[5].mxu1  ;;  %v466_v48 = vadd.f32 %v465_v46, %v94_v40  ;;  %v107_v46 = vld [vmem:[%s1982_s2 + $0x88] sm:$0xff] }
  0xea   :  { %v646_v49 = vadd.f32 %v645_v47, %v130_v41  ;;  %809 = vst.msk [vmem:[%s1983_s3 + $0x28] sm:$0xff] %vm162_vm0, %v471_v44  ;;  %v143_v47 = vld [vmem:[%s1982_s2 + $0x1a8] sm:$0xff] }
  0xeb   :  { %845 = vst.msk [vmem:[%s1983_s3 + $0x148] sm:$0xff] %vm162_vm0, %v651_v45  ;;  %808 = vst.msk [vmem:[%s1983_s3 + $0x20] sm:$0xff] %vm162_vm0, %v466_v48  ;;  %v1047_v54 = vpop.f32.mrb[6].mxu0  ;;  %v106_v48 = vld [vmem:[%s1982_s2 + $0x80] sm:$0xff] }
  0xec   :  { %844 = vst.msk [vmem:[%s1983_s3 + $0x140] sm:$0xff] %vm162_vm0, %v646_v49  ;;  %v1101_v55 = vpop.f32.mrb[6].mxu1  ;;  %v481_v56 = vadd.f32 %v1047_v54, %v97_v50  ;;  %v475_v58 = vpop.f32.mrb[7].mxu0  ;;  %v142_v49 = vld [vmem:[%s1982_s2 + $0x1a0] sm:$0xff] }
  0xed   :  { %v661_v57 = vadd.f32 %v1101_v55, %v133_v51  ;;  %v655_v59 = vpop.f32.mrb[7].mxu1  ;;  %v476_v60 = vadd.f32 %v475_v58, %v96_v52  ;;  %v109_v58 = vld [vmem:[%s1982_s2 + $0x98] sm:$0xff] }
  0xee   :  { %v656_v61 = vadd.f32 %v655_v59, %v132_v53  ;;  %811 = vst.msk [vmem:[%s1983_s3 + $0x38] sm:$0xff] %vm162_vm0, %v481_v56  ;;  %v145_v59 = vld [vmem:[%s1982_s2 + $0x1b8] sm:$0xff] }
  0xef   :  { %847 = vst.msk [vmem:[%s1983_s3 + $0x158] sm:$0xff] %vm162_vm0, %v661_v57  ;;  %810 = vst.msk [vmem:[%s1983_s3 + $0x30] sm:$0xff] %vm162_vm0, %v476_v60  ;;  %v1050_v2 = vpop.f32.mrb[8].mxu0  ;;  %v108_v60 = vld [vmem:[%s1982_s2 + $0x90] sm:$0xff] }
  0xf0   :  { %846 = vst.msk [vmem:[%s1983_s3 + $0x150] sm:$0xff] %vm162_vm0, %v656_v61  ;;  %v1104_v3 = vpop.f32.mrb[8].mxu1  ;;  %v491_v4 = vadd.f32 %v1050_v2, %v99_v62  ;;  %v485_v6 = vpop.f32.mrb[9].mxu0  ;;  %v144_v61 = vld [vmem:[%s1982_s2 + $0x1b0] sm:$0xff] }
  0xf1   :  { %v671_v5 = vadd.f32 %v1104_v3, %v135_v63  ;;  %v665_v7 = vpop.f32.mrb[9].mxu1  ;;  %v486_v8 = vadd.f32 %v485_v6, %v98_v0  ;;  %v111_v6 = vld [vmem:[%s1982_s2 + $0xa8] sm:$0xff] }
  0xf2   :  { %v666_v9 = vadd.f32 %v665_v7, %v134_v1  ;;  %813 = vst.msk [vmem:[%s1983_s3 + $0x48] sm:$0xff] %vm162_vm0, %v491_v4  ;;  %v147_v7 = vld [vmem:[%s1982_s2 + $0x1c8] sm:$0xff] }
  0xf3   :  { %849 = vst.msk [vmem:[%s1983_s3 + $0x168] sm:$0xff] %vm162_vm0, %v671_v5  ;;  %812 = vst.msk [vmem:[%s1983_s3 + $0x40] sm:$0xff] %vm162_vm0, %v486_v8  ;;  %v1053_v14 = vpop.f32.mrb[10].mxu0  ;;  %v110_v8 = vld [vmem:[%s1982_s2 + $0xa0] sm:$0xff] }
  0xf4   :  { %848 = vst.msk [vmem:[%s1983_s3 + $0x160] sm:$0xff] %vm162_vm0, %v666_v9  ;;  %v1107_v15 = vpop.f32.mrb[10].mxu1  ;;  %v501_v16 = vadd.f32 %v1053_v14, %v101_v10  ;;  %v495_v18 = vpop.f32.mrb[11].mxu0  ;;  %v146_v9 = vld [vmem:[%s1982_s2 + $0x1c0] sm:$0xff] }
  0xf5   :  { %v681_v17 = vadd.f32 %v1107_v15, %v137_v11  ;;  %v675_v19 = vpop.f32.mrb[11].mxu1  ;;  %v496_v20 = vadd.f32 %v495_v18, %v100_v12  ;;  %v113_v18 = vld [vmem:[%s1982_s2 + $0xb8] sm:$0xff] }
  0xf6   :  { %v676_v21 = vadd.f32 %v675_v19, %v136_v13  ;;  %815 = vst.msk [vmem:[%s1983_s3 + $0x58] sm:$0xff] %vm162_vm0, %v501_v16  ;;  %v149_v19 = vld [vmem:[%s1982_s2 + $0x1d8] sm:$0xff] }
  0xf7   :  { %851 = vst.msk [vmem:[%s1983_s3 + $0x178] sm:$0xff] %vm162_vm0, %v681_v17  ;;  %814 = vst.msk [vmem:[%s1983_s3 + $0x50] sm:$0xff] %vm162_vm0, %v496_v20  ;;  %v1056_v26 = vpop.f32.mrb[12].mxu0  ;;  %v112_v20 = vld [vmem:[%s1982_s2 + $0xb0] sm:$0xff] }
  0xf8   :  { %850 = vst.msk [vmem:[%s1983_s3 + $0x170] sm:$0xff] %vm162_vm0, %v676_v21  ;;  %v1110_v27 = vpop.f32.mrb[12].mxu1  ;;  %v511_v28 = vadd.f32 %v1056_v26, %v103_v22  ;;  %v505_v30 = vpop.f32.mrb[13].mxu0  ;;  %v148_v21 = vld [vmem:[%s1982_s2 + $0x1d0] sm:$0xff] }
  0xf9   :  { %v691_v29 = vadd.f32 %v1110_v27, %v139_v23  ;;  %v685_v31 = vpop.f32.mrb[13].mxu1  ;;  %v506_v32 = vadd.f32 %v505_v30, %v102_v24  ;;  %v115_v30 = vld [vmem:[%s1982_s2 + $0xc8] sm:$0xff] }
  0xfa   :  { %v686_v33 = vadd.f32 %v685_v31, %v138_v25  ;;  %817 = vst.msk [vmem:[%s1983_s3 + $0x68] sm:$0xff] %vm162_vm0, %v511_v28  ;;  %v151_v31 = vld [vmem:[%s1982_s2 + $0x1e8] sm:$0xff] }
  0xfb   :  { %853 = vst.msk [vmem:[%s1983_s3 + $0x188] sm:$0xff] %vm162_vm0, %v691_v29  ;;  %816 = vst.msk [vmem:[%s1983_s3 + $0x60] sm:$0xff] %vm162_vm0, %v506_v32  ;;  %v1059_v38 = vpop.f32.mrb[14].mxu0  ;;  %v114_v32 = vld [vmem:[%s1982_s2 + $0xc0] sm:$0xff] }
  0xfc   :  { %852 = vst.msk [vmem:[%s1983_s3 + $0x180] sm:$0xff] %vm162_vm0, %v686_v33  ;;  %v1113_v39 = vpop.f32.mrb[14].mxu1  ;;  %v521_v40 = vadd.f32 %v1059_v38, %v105_v34  ;;  %v515_v42 = vpop.f32.mrb[15].mxu0  ;;  %v150_v33 = vld [vmem:[%s1982_s2 + $0x1e0] sm:$0xff] }
  0xfd   :  { %v701_v41 = vadd.f32 %v1113_v39, %v141_v35  ;;  %v695_v43 = vpop.f32.mrb[15].mxu1  ;;  %v516_v44 = vadd.f32 %v515_v42, %v104_v36  ;;  %v117_v42 = vld [vmem:[%s1982_s2 + $0xd8] sm:$0xff] }
  0xfe   :  { %v696_v45 = vadd.f32 %v695_v43, %v140_v37  ;;  %819 = vst.msk [vmem:[%s1983_s3 + $0x78] sm:$0xff] %vm162_vm0, %v521_v40  ;;  %v153_v43 = vld [vmem:[%s1982_s2 + $0x1f8] sm:$0xff] }
  0xff   :  { %855 = vst.msk [vmem:[%s1983_s3 + $0x198] sm:$0xff] %vm162_vm0, %v701_v41  ;;  %818 = vst.msk [vmem:[%s1983_s3 + $0x70] sm:$0xff] %vm162_vm0, %v516_v44  ;;  %v1062_v50 = vpop.f32.mrb[16].mxu0  ;;  %v116_v44 = vld [vmem:[%s1982_s2 + $0xd0] sm:$0xff] }
 0x100   :  { %854 = vst.msk [vmem:[%s1983_s3 + $0x190] sm:$0xff] %vm162_vm0, %v696_v45  ;;  %v1116_v51 = vpop.f32.mrb[16].mxu1  ;;  %v531_v52 = vadd.f32 %v1062_v50, %v107_v46  ;;  %v525_v54 = vpop.f32.mrb[17].mxu0  ;;  %v152_v45 = vld [vmem:[%s1982_s2 + $0x1f0] sm:$0xff] }
 0x101   :  { %v711_v53 = vadd.f32 %v1116_v51, %v143_v47  ;;  %v705_v55 = vpop.f32.mrb[17].mxu1  ;;  %v526_v56 = vadd.f32 %v525_v54, %v106_v48  ;;  %v119_v54 = vld [vmem:[%s1982_s2 + $0xe8] sm:$0xff] }
 0x102   :  { %v706_v57 = vadd.f32 %v705_v55, %v142_v49  ;;  %821 = vst.msk [vmem:[%s1983_s3 + $0x88] sm:$0xff] %vm162_vm0, %v531_v52  ;;  %v155_v55 = vld [vmem:[%s1982_s2 + $0x208] sm:$0xff] }
 0x103   :  { %857 = vst.msk [vmem:[%s1983_s3 + $0x1a8] sm:$0xff] %vm162_vm0, %v711_v53  ;;  %820 = vst.msk [vmem:[%s1983_s3 + $0x80] sm:$0xff] %vm162_vm0, %v526_v56  ;;  %v1065_v62 = vpop.f32.mrb[18].mxu0  ;;  %v118_v56 = vld [vmem:[%s1982_s2 + $0xe0] sm:$0xff] }
 0x104   :  { %856 = vst.msk [vmem:[%s1983_s3 + $0x1a0] sm:$0xff] %vm162_vm0, %v706_v57  ;;  %v1119_v63 = vpop.f32.mrb[18].mxu1  ;;  %v541_v0 = vadd.f32 %v1065_v62, %v109_v58  ;;  %v535_v2 = vpop.f32.mrb[19].mxu0  ;;  %v154_v57 = vld [vmem:[%s1982_s2 + $0x200] sm:$0xff] }
 0x105   :  { %v721_v1 = vadd.f32 %v1119_v63, %v145_v59  ;;  %v715_v3 = vpop.f32.mrb[19].mxu1  ;;  %v536_v4 = vadd.f32 %v535_v2, %v108_v60  ;;  %v121_v2 = vld [vmem:[%s1982_s2 + $0xf8] sm:$0xff] }
 0x106   :  { %v716_v5 = vadd.f32 %v715_v3, %v144_v61  ;;  %823 = vst.msk [vmem:[%s1983_s3 + $0x98] sm:$0xff] %vm162_vm0, %v541_v0  ;;  %v157_v3 = vld [vmem:[%s1982_s2 + $0x218] sm:$0xff] }
 0x107   :  { %859 = vst.msk [vmem:[%s1983_s3 + $0x1b8] sm:$0xff] %vm162_vm0, %v721_v1  ;;  %822 = vst.msk [vmem:[%s1983_s3 + $0x90] sm:$0xff] %vm162_vm0, %v536_v4  ;;  %v1068_v10 = vpop.f32.mrb[20].mxu0  ;;  %v120_v4 = vld [vmem:[%s1982_s2 + $0xf0] sm:$0xff] }
 0x108   :  { %858 = vst.msk [vmem:[%s1983_s3 + $0x1b0] sm:$0xff] %vm162_vm0, %v716_v5  ;;  %v1122_v11 = vpop.f32.mrb[20].mxu1  ;;  %v551_v12 = vadd.f32 %v1068_v10, %v111_v6  ;;  %v545_v14 = vpop.f32.mrb[21].mxu0  ;;  %v156_v5 = vld [vmem:[%s1982_s2 + $0x210] sm:$0xff] }
 0x109   :  { %v731_v13 = vadd.f32 %v1122_v11, %v147_v7  ;;  %v725_v15 = vpop.f32.mrb[21].mxu1  ;;  %v546_v16 = vadd.f32 %v545_v14, %v110_v8  ;;  %v123_v14 = vld [vmem:[%s1982_s2 + $0x108] sm:$0xff] }
 0x10a   :  { %v726_v17 = vadd.f32 %v725_v15, %v146_v9  ;;  %825 = vst.msk [vmem:[%s1983_s3 + $0xa8] sm:$0xff] %vm162_vm0, %v551_v12  ;;  %v159_v15 = vld [vmem:[%s1982_s2 + $0x228] sm:$0xff] }
 0x10b   :  { %861 = vst.msk [vmem:[%s1983_s3 + $0x1c8] sm:$0xff] %vm162_vm0, %v731_v13  ;;  %824 = vst.msk [vmem:[%s1983_s3 + $0xa0] sm:$0xff] %vm162_vm0, %v546_v16  ;;  %v1071_v22 = vpop.f32.mrb[22].mxu0  ;;  %v122_v16 = vld [vmem:[%s1982_s2 + $0x100] sm:$0xff] }
 0x10c   :  { %860 = vst.msk [vmem:[%s1983_s3 + $0x1c0] sm:$0xff] %vm162_vm0, %v726_v17  ;;  %v1125_v23 = vpop.f32.mrb[22].mxu1  ;;  %v561_v24 = vadd.f32 %v1071_v22, %v113_v18  ;;  %v555_v26 = vpop.f32.mrb[23].mxu0  ;;  %v158_v17 = vld [vmem:[%s1982_s2 + $0x220] sm:$0xff] }
 0x10d   :  { %v741_v25 = vadd.f32 %v1125_v23, %v149_v19  ;;  %v735_v27 = vpop.f32.mrb[23].mxu1  ;;  %v556_v28 = vadd.f32 %v555_v26, %v112_v20  ;;  %v125_v26 = vld [vmem:[%s1982_s2 + $0x118] sm:$0xff] }
 0x10e   :  { %v736_v29 = vadd.f32 %v735_v27, %v148_v21  ;;  %827 = vst.msk [vmem:[%s1983_s3 + $0xb8] sm:$0xff] %vm162_vm0, %v561_v24  ;;  %v161_v27 = vld [vmem:[%s1982_s2 + $0x238] sm:$0xff] }
 0x10f   :  { %863 = vst.msk [vmem:[%s1983_s3 + $0x1d8] sm:$0xff] %vm162_vm0, %v741_v25  ;;  %826 = vst.msk [vmem:[%s1983_s3 + $0xb0] sm:$0xff] %vm162_vm0, %v556_v28  ;;  %v1074_v34 = vpop.f32.mrb[24].mxu0  ;;  %v124_v28 = vld [vmem:[%s1982_s2 + $0x110] sm:$0xff] }
 0x110   :  { %862 = vst.msk [vmem:[%s1983_s3 + $0x1d0] sm:$0xff] %vm162_vm0, %v736_v29  ;;  %v1128_v35 = vpop.f32.mrb[24].mxu1  ;;  %v571_v36 = vadd.f32 %v1074_v34, %v115_v30  ;;  %v565_v38 = vpop.f32.mrb[25].mxu0  ;;  %v160_v29 = vld [vmem:[%s1982_s2 + $0x230] sm:$0xff] }
 0x111   :  { %v751_v37 = vadd.f32 %v1128_v35, %v151_v31  ;;  %v745_v39 = vpop.f32.mrb[25].mxu1  ;;  %v566_v40 = vadd.f32 %v565_v38, %v114_v32 }
 0x112   :  { %v746_v41 = vadd.f32 %v745_v39, %v150_v33  ;;  %829 = vst.msk [vmem:[%s1983_s3 + $0xc8] sm:$0xff] %vm162_vm0, %v571_v36 }
 0x113   :  { %865 = vst.msk [vmem:[%s1983_s3 + $0x1e8] sm:$0xff] %vm162_vm0, %v751_v37  ;;  %828 = vst.msk [vmem:[%s1983_s3 + $0xc0] sm:$0xff] %vm162_vm0, %v566_v40  ;;  %v1077_v46 = vpop.f32.mrb[26].mxu0 }
 0x114   :  { %864 = vst.msk [vmem:[%s1983_s3 + $0x1e0] sm:$0xff] %vm162_vm0, %v746_v41  ;;  %v1131_v47 = vpop.f32.mrb[26].mxu1  ;;  %v581_v48 = vadd.f32 %v1077_v46, %v117_v42  ;;  %v575_v50 = vpop.f32.mrb[27].mxu0 }
 0x115   :  { %v761_v49 = vadd.f32 %v1131_v47, %v153_v43  ;;  %v755_v51 = vpop.f32.mrb[27].mxu1  ;;  %v576_v52 = vadd.f32 %v575_v50, %v116_v44 }
 0x116   :  { %v756_v53 = vadd.f32 %v755_v51, %v152_v45  ;;  %831 = vst.msk [vmem:[%s1983_s3 + $0xd8] sm:$0xff] %vm162_vm0, %v581_v48 }
 0x117   :  { %867 = vst.msk [vmem:[%s1983_s3 + $0x1f8] sm:$0xff] %vm162_vm0, %v761_v49  ;;  %830 = vst.msk [vmem:[%s1983_s3 + $0xd0] sm:$0xff] %vm162_vm0, %v576_v52  ;;  %v1080_v58 = vpop.f32.mrb[28].mxu0 }
 0x118   :  { %866 = vst.msk [vmem:[%s1983_s3 + $0x1f0] sm:$0xff] %vm162_vm0, %v756_v53  ;;  %v1134_v59 = vpop.f32.mrb[28].mxu1  ;;  %v591_v60 = vadd.f32 %v1080_v58, %v119_v54  ;;  %v585_v62 = vpop.f32.mrb[29].mxu0 }
 0x119   :  { %v771_v61 = vadd.f32 %v1134_v59, %v155_v55  ;;  %v765_v63 = vpop.f32.mrb[29].mxu1  ;;  %v586_v0 = vadd.f32 %v585_v62, %v118_v56 }
 0x11a   :  { %v766_v1 = vadd.f32 %v765_v63, %v154_v57  ;;  %833 = vst.msk [vmem:[%s1983_s3 + $0xe8] sm:$0xff] %vm162_vm0, %v591_v60 }
 0x11b   :  { %869 = vst.msk [vmem:[%s1983_s3 + $0x208] sm:$0xff] %vm162_vm0, %v771_v61  ;;  %832 = vst.msk [vmem:[%s1983_s3 + $0xe0] sm:$0xff] %vm162_vm0, %v586_v0  ;;  %v1083_v6 = vpop.f32.mrb[30].mxu0 }
 0x11c   :  { %868 = vst.msk [vmem:[%s1983_s3 + $0x200] sm:$0xff] %vm162_vm0, %v766_v1  ;;  %v1137_v7 = vpop.f32.mrb[30].mxu1  ;;  %v601_v8 = vadd.f32 %v1083_v6, %v121_v2  ;;  %v595_v10 = vpop.f32.mrb[31].mxu0 }
 0x11d   :  { %v781_v9 = vadd.f32 %v1137_v7, %v157_v3  ;;  %v775_v11 = vpop.f32.mrb[31].mxu1  ;;  %v596_v12 = vadd.f32 %v595_v10, %v120_v4 }
 0x11e   :  { %v776_v13 = vadd.f32 %v775_v11, %v156_v5  ;;  %835 = vst.msk [vmem:[%s1983_s3 + $0xf8] sm:$0xff] %vm162_vm0, %v601_v8 }
 0x11f   :  { %871 = vst.msk [vmem:[%s1983_s3 + $0x218] sm:$0xff] %vm162_vm0, %v781_v9  ;;  %834 = vst.msk [vmem:[%s1983_s3 + $0xf0] sm:$0xff] %vm162_vm0, %v596_v12  ;;  %v1086_v18 = vpop.f32.mrb[32].mxu0 }
 0x120   :  { %870 = vst.msk [vmem:[%s1983_s3 + $0x210] sm:$0xff] %vm162_vm0, %v776_v13  ;;  %v1140_v19 = vpop.f32.mrb[32].mxu1  ;;  %v611_v20 = vadd.f32 %v1086_v18, %v123_v14  ;;  %v605_v22 = vpop.f32.mrb[33].mxu0 }
 0x121   :  { %v791_v21 = vadd.f32 %v1140_v19, %v159_v15  ;;  %v785_v23 = vpop.f32.mrb[33].mxu1  ;;  %v606_v24 = vadd.f32 %v605_v22, %v122_v16 }
 0x122   :  { %v786_v25 = vadd.f32 %v785_v23, %v158_v17  ;;  %837 = vst.msk [vmem:[%s1983_s3 + $0x108] sm:$0xff] %vm162_vm0, %v611_v20 }
 0x123   :  { %873 = vst.msk [vmem:[%s1983_s3 + $0x228] sm:$0xff] %vm162_vm0, %v791_v21  ;;  %836 = vst.msk [vmem:[%s1983_s3 + $0x100] sm:$0xff] %vm162_vm0, %v606_v24  ;;  %v1089_v30 = vpop.f32.mrb[34].mxu0 }
 0x124   :  { %872 = vst.msk [vmem:[%s1983_s3 + $0x220] sm:$0xff] %vm162_vm0, %v786_v25  ;;  %v1143_v31 = vpop.f32.mrb[34].mxu1  ;;  %v621_v32 = vadd.f32 %v1089_v30, %v125_v26  ;;  %v615_v34 = vpop.f32.mrb[35].mxu0 }
 0x125   :  { %v801_v33 = vadd.f32 %v1143_v31, %v161_v27  ;;  %v795_v35 = vpop.f32.mrb[35].mxu1  ;;  %v616_v36 = vadd.f32 %v615_v34, %v124_v28 }
 0x126   :  { %v796_v37 = vadd.f32 %v795_v35, %v160_v29  ;;  %839 = vst.msk [vmem:[%s1983_s3 + $0x118] sm:$0xff] %vm162_vm0, %v621_v32 }
 0x127   :  { %875 = vst.msk [vmem:[%s1983_s3 + $0x238] sm:$0xff] %vm162_vm0, %v801_v33  ;;  %838 = vst.msk [vmem:[%s1983_s3 + $0x110] sm:$0xff] %vm162_vm0, %v616_v36 }
 0x128   :  { %874 = vst.msk [vmem:[%s1983_s3 + $0x230] sm:$0xff] %vm162_vm0, %v796_v37 }

</bundles_post_ra>
